<compile_context>
chip_gen: v6e
topology: v6e:2x2x1
jax: 0.10.0
libtpu: 0.0.40
codegen_flags: <defaults>
</compile_context>

<pallas_src>
import functools

import jax
import jax.numpy as jnp
from jax.experimental import pallas as pl
from jax.experimental.pallas import tpu as pltpu


def _round_up(x: int, m: int) -> int:
    return ((x + m - 1) // m) * m


def _linear_block_kernel(x_ref, w_ref, b_ref, o_ref, acc_ref, *, act_thres,
                         apply_act):
    """General tiled matmul with K-reduction accumulator and fused epilogue.

    Grid = (N//tn, M//tm, K//tk); K (last axis) is the reduction axis and is
    marked 'arbitrary'; the f32 accumulator lives in VMEM scratch.
    x tile: [tm, tk], w tile: [tn, tk]  (PyTorch [Cout, Cin] layout, no
    wrapper transpose) -> contract both on their last dim.
    """
    k = pl.program_id(2)

    @pl.when(k == 0)
    def _():
        acc_ref[...] = jnp.zeros_like(acc_ref)

    acc_ref[...] += jax.lax.dot_general(
        x_ref[...], w_ref[...],
        dimension_numbers=(((1,), (1,)), ((), ())),
        preferred_element_type=jnp.float32,
    )

    @pl.when(k == pl.num_programs(2) - 1)
    def _():
        out = acc_ref[...] + b_ref[...]          # (1, tn) broadcasts over (tm, tn)
        if apply_act:
            out = jnp.clip(out, 0.0, float(act_thres))
        o_ref[...] = out.astype(o_ref.dtype)


def _linear_block_kernel_single_k(x_ref, w_ref, b_ref, o_ref, *, act_thres,
                                  apply_act):
    """K fits in one block: no scratch accumulator, write result directly."""
    out = jax.lax.dot_general(
        x_ref[...], w_ref[...],
        dimension_numbers=(((1,), (1,)), ((), ())),
        preferred_element_type=jnp.float32,
    ) + b_ref[...]
    if apply_act:
        out = jnp.clip(out, 0.0, float(act_thres))
    o_ref[...] = out.astype(o_ref.dtype)


def linear_block(
    x: jax.Array,
    weight: jax.Array,
    bias: jax.Array | None = None,
    *,
    activation: bool = True,
    act_thres: int = 6,
    tm: int = 256,
    tn: int = 512,
    tk: int = 512,
):
    """x: [B, Cin] float32, weight: [Cout, Cin] float32 (PyTorch layout),
    bias: [Cout] or None."""
    B, Cin = x.shape
    Cout, Cin_w = weight.shape
    assert Cin == Cin_w
    out_dtype = x.dtype

    # Clamp tiles to (padded) array extents; keep (8, 128) alignment.
    tm = _round_up(min(tm, _round_up(B, 8)), 8)
    tn = _round_up(min(tn, _round_up(Cout, 128)), 128)
    tk = _round_up(min(tk, _round_up(Cin, 128)), 128)

    Mp = _round_up(B, tm)
    Np = _round_up(Cout, tn)
    Kp = _round_up(Cin, tk)

    # Zero-pad to tile multiples (zeros do not change the matmul result).
    if (Mp, Kp) != (B, Cin):
        x = jnp.pad(x, ((0, Mp - B), (0, Kp - Cin)))
    if (Np, Kp) != (Cout, Cin):
        weight = jnp.pad(weight, ((0, Np - Cout), (0, Kp - Cin)))
    if bias is None:
        bias2d = jnp.zeros((1, Np), dtype=jnp.float32)
    else:
        bias2d = jnp.pad(bias.astype(jnp.float32).reshape(1, Cout),
                         ((0, 0), (0, Np - Cout)))

    gm, gn, gk = Mp // tm, Np // tn, Kp // tk

    itemsize = x.dtype.itemsize
    vmem_bytes = (
        2 * (tm * tk + tn * tk) * itemsize   # double-buffered x / w tiles
        + 2 * tm * tn * itemsize             # double-buffered output tile
        + 2 * tn * 4                         # bias tile
        + tm * tn * 4                        # f32 accumulator scratch
    )
    vmem_limit = min(max(32 << 20, int(vmem_bytes * 2) + (4 << 20)), 64 << 20)

    cost = pl.CostEstimate(
        flops=2 * B * Cin * Cout,
        transcendentals=0,
        bytes_accessed=itemsize * (B * Cin + Cout * Cin + B * Cout) + 4 * Cout,
    )

    if gk == 1:
        kernel = functools.partial(
            _linear_block_kernel_single_k,
            act_thres=act_thres, apply_act=activation)
        out_p = pl.pallas_call(
            kernel,
            out_shape=jax.ShapeDtypeStruct((Mp, Np), out_dtype),
            grid_spec=pltpu.PrefetchScalarGridSpec(
                num_scalar_prefetch=0,
                grid=(gn, gm),                      # N leading (parallel)
                in_specs=[
                    pl.BlockSpec((tm, tk), lambda j, i: (i, 0)),
                    pl.BlockSpec((tn, tk), lambda j, i: (j, 0)),
                    pl.BlockSpec((1, tn), lambda j, i: (0, j)),
                ],
                out_specs=pl.BlockSpec((tm, tn), lambda j, i: (i, j)),
            ),
            compiler_params=pltpu.CompilerParams(
                dimension_semantics=("parallel", "parallel"),
                vmem_limit_bytes=vmem_limit,
            ),
            cost_estimate=cost,
        )(x, weight, bias2d)
    else:
        kernel = functools.partial(
            _linear_block_kernel,
            act_thres=act_thres, apply_act=activation)
        out_p = pl.pallas_call(
            kernel,
            out_shape=jax.ShapeDtypeStruct((Mp, Np), out_dtype),
            grid_spec=pltpu.PrefetchScalarGridSpec(
                num_scalar_prefetch=0,
                grid=(gn, gm, gk),                  # N leading, K last (reduction)
                in_specs=[
                    pl.BlockSpec((tm, tk), lambda j, i, k: (i, k)),
                    pl.BlockSpec((tn, tk), lambda j, i, k: (j, k)),
                    pl.BlockSpec((1, tn), lambda j, i, k: (0, j)),
                ],
                out_specs=pl.BlockSpec((tm, tn), lambda j, i, k: (i, j)),
                scratch_shapes=[pltpu.VMEM((tm, tn), jnp.float32)],
            ),
            compiler_params=pltpu.CompilerParams(
                dimension_semantics=("parallel", "parallel", "arbitrary"),
                vmem_limit_bytes=vmem_limit,
            ),
            cost_estimate=cost,
        )(x, weight, bias2d)

    if (Mp, Np) != (B, Cout):
        out_p = out_p[:B, :Cout]
    return out_p


if __name__ == "__main__":
    key = jax.random.PRNGKey(0)
    k_x, k_w, k_b = jax.random.split(key, 3)

    # Small shapes consistent with a LinearBlock (non-aligned to exercise
    # the padding path).
    B, Cin, Cout = 16, 96, 80
    x = jax.random.normal(k_x, (B, Cin), dtype=jnp.float32)
    bound = 1.0 / jnp.sqrt(Cin)
    weight = jax.random.uniform(
        k_w, (Cout, Cin), minval=-bound, maxval=bound, dtype=jnp.float32)
    bias = jax.random.uniform(
        k_b, (Cout,), minval=-bound, maxval=bound, dtype=jnp.float32)

    # Default LinearBlock config: bias=False, activation=True, act_thres=6.
    y = linear_block(x, weight, bias=None, activation=True, act_thres=6)
    jax.block_until_ready(y)
    y_ref = jnp.clip(x @ weight.T, 0.0, 6.0)
    assert y.shape == (B, Cout)
    assert jnp.allclose(y, y_ref, atol=1e-5, rtol=1e-5)

    # bias=True path: fused (dot + bias) -> clamp epilogue (single clamp).
    yb = linear_block(x, weight, bias=bias, activation=True, act_thres=6)
    jax.block_until_ready(yb)
    yb_ref = jnp.clip(x @ weight.T + bias[None, :], 0.0, 6.0)
    assert jnp.allclose(yb, yb_ref, atol=1e-5, rtol=1e-5)

    # Multi-K-step config: exercises the VMEM accumulator kernel path.
    B2, Cin2, Cout2 = 16, 256, 256
    x2 = jax.random.normal(k_x, (B2, Cin2), dtype=jnp.float32)
    bound2 = 1.0 / jnp.sqrt(Cin2)
    w2 = jax.random.uniform(
        k_w, (Cout2, Cin2), minval=-bound2, maxval=bound2, dtype=jnp.float32)
    y2 = linear_block(x2, w2, bias=None, activation=True, act_thres=6,
                      tm=16, tn=128, tk=128)
    jax.block_until_ready(y2)
    y2_ref = jnp.clip(x2 @ w2.T, 0.0, 6.0)
    assert jnp.allclose(y2, y2_ref, atol=1e-4, rtol=1e-5)

    print("KERNEL_OK")
</pallas_src>

<mosaic_0001>
module attributes {stable_mosaic.version = 11 : i64} {
  func.func @_linear_block_kernel_single_k(%arg0: i32, %arg1: i32, %arg2: memref<16x128xf32, #tpu.memory_space<vmem>>, %arg3: memref<128x128xf32, #tpu.memory_space<vmem>>, %arg4: memref<1x128xf32, #tpu.memory_space<vmem>>, %arg5: memref<16x128xf32, #tpu.memory_space<vmem>>) attributes {dimension_semantics = [#tpu.dimension_semantics<parallel>, #tpu.dimension_semantics<parallel>], iteration_bounds = array<i64: 1, 1>, scalar_prefetch = 0 : i64, scratch_operands = 0 : i64, tpu.core_type = #tpu.core_type<tc>, window_params = [{transform_indices = @transform_0, window_bounds = array<i64: 16, 128>}, {transform_indices = @transform_1, window_bounds = array<i64: 128, 128>}, {transform_indices = @transform_2, window_bounds = array<i64: 1, 128>}, {transform_indices = @transform_3, window_bounds = array<i64: 16, 128>}]} {
    %c0 = arith.constant 0 : index
    %c0_0 = arith.constant 0 : index
    %0 = vector.load %arg2[%c0, %c0_0] : memref<16x128xf32, #tpu.memory_space<vmem>>, vector<16x128xf32>
    %c0_1 = arith.constant 0 : index
    %c0_2 = arith.constant 0 : index
    %1 = vector.load %arg3[%c0_1, %c0_2] : memref<128x128xf32, #tpu.memory_space<vmem>>, vector<128x128xf32>
    %cst = arith.constant dense<0.000000e+00> : vector<16x128xf32>
    %2 = tpu.matmul %0, %1, %cst {dimension_numbers = #tpu.dot_dimension_numbers<[1], [1], [0], [0], [0, 0, 1, 0], [], []>} : vector<16x128xf32>, vector<128x128xf32>, vector<16x128xf32> -> vector<16x128xf32>
    %c0_3 = arith.constant 0 : index
    %c0_4 = arith.constant 0 : index
    %3 = vector.load %arg4[%c0_3, %c0_4] : memref<1x128xf32, #tpu.memory_space<vmem>>, vector<1x128xf32>
    %4 = vector.broadcast %3 : vector<1x128xf32> to vector<16x128xf32>
    %5 = arith.addf %2, %4 : vector<16x128xf32>
    %cst_5 = arith.constant 0.000000e+00 : f32
    %cst_6 = arith.constant 6.000000e+00 : f32
    %6 = vector.broadcast %cst_5 : f32 to vector<16x128xf32>
    %7 = arith.maximumf %6, %5 : vector<16x128xf32>
    %8 = vector.broadcast %cst_6 : f32 to vector<16x128xf32>
    %9 = arith.minimumf %8, %7 : vector<16x128xf32>
    %c0_7 = arith.constant 0 : index
    %c0_8 = arith.constant 0 : index
    %10 = vector.load %arg5[%c0_7, %c0_8] : memref<16x128xf32, #tpu.memory_space<vmem>>, vector<16x128xf32>
    tpu.vector_store %arg5[%c0_7, %c0_8], %9 {strides = array<i32>} : memref<16x128xf32, #tpu.memory_space<vmem>>, vector<16x128xf32>,
    return
  }
  func.func @transform_0(%arg0: i32, %arg1: i32) -> (i32, i32) {
    %c0_i32 = arith.constant 0 : i32
    %c0_i32_0 = arith.constant 0 : i32
    return %arg1, %c0_i32 : i32, i32
  }
  func.func @transform_1(%arg0: i32, %arg1: i32) -> (i32, i32) {
    %c0_i32 = arith.constant 0 : i32
    %c0_i32_0 = arith.constant 0 : i32
    return %arg0, %c0_i32 : i32, i32
  }
  func.func @transform_2(%arg0: i32, %arg1: i32) -> (i32, i32) {
    %c0_i32 = arith.constant 0 : i32
    %c0_i32_0 = arith.constant 0 : i32
    return %c0_i32, %arg0 : i32, i32
  }
  func.func @transform_3(%arg0: i32, %arg1: i32) -> (i32, i32) {
    %c0_i32 = arith.constant 0 : i32
    return %arg1, %arg0 : i32, i32
  }
}

</mosaic_0001>

<bundles_post_ra>
// kernel: tpu_custom_call.1
= control target key start
LH: loop header
LB: loop body
LE: loop exit
PB: predicated region body
PF: predicated region fallthrough
CT: control target
= control target key end

     0   :  { %8 = vsyncpa [#allocation3], 0  ;;  %s338_s0 = inlined_call_operand.hbm [shape: f32[16,128], index: 0, kind: input, shape index: {}]   ;;  %s339_s1 = inlined_call_operand.hbm [shape: f32[128,128], index: 1, kind: input, shape index: {}]   ;;  %s340_s2 = inlined_call_operand.vmem [shape: f32[1,128], index: 2, kind: input, shape index: {}]   ;;  %s341_s3 = inlined_call_operand.hbm [shape: f32[16,128], index: 3, kind: output, shape index: {}]  }
   0x1   :  { %9 = vsyncpa [#allocation6], 0 }
   0x2   :  { %10 = vsyncpa [#allocation4], 0  ;;  %s292_s12 = smov [#allocation2]  }
   0x3   :  { %s16_s13 = sshll.u32 %s292_s12, 4  ;;  %s17_s13 = int_to_ptr.vmem [resolvable:$true] %s16_s13 }
   0x4   :  { %s234_s14 = scalar_lea.vmem %s17_s13, 256  ;;  %p239_p1 = scmp.lt.s32.totalorder %s17_s13, %s17_s13 }
   0x5   :  { %p235_p0 = scmp.ne.s32.totalorder %s17_s13, %s234_s14  ;;  %p240_p2 = scmp.lt.s32.totalorder %s234_s14, %s234_s14 }
   0x7   :  { %p241_p3 = por %p240_p2, %p239_p1 }
   0x9   :  { %p242_p4 = pnand %p241_p3, %p235_p0 }
   0xb   :  { %245 = shalt.err (!%p242_p4)
}
   0xc   :  { %s293_s15 = smov 128   ;;  %s294_s16 = smov 8  }
   0xd   :  { %22 = dma.hbm_to_vmem [thread:$0]  %s338_s0, 256, %s17_s13, [#allocation3], %s293_s15, %s293_s15, %s294_s16  }
   0xe   :  { %s295_s19 = smov [#allocation5]  }
   0xf   :  { %s28_s20 = sshll.u32 %s295_s19, 4  ;;  %s29_s20 = int_to_ptr.vmem [resolvable:$true] %s28_s20 }
  0x10   :  { %s254_s21 = scalar_lea.vmem %s29_s20, 2048  ;;  %p259_p6 = scmp.lt.s32.totalorder %s29_s20, %s29_s20 }
  0x11   :  { %p255_p5 = scmp.ne.s32.totalorder %s29_s20, %s254_s21  ;;  %p260_p7 = scmp.lt.s32.totalorder %s254_s21, %s254_s21 }
  0x13   :  { %p261_p8 = por %p260_p7, %p259_p6 }
  0x15   :  { %p262_p9 = pnand %p261_p8, %p255_p5 }
  0x17   :  { %265 = shalt.err (!%p262_p9)
}
  0x18   :  { %34 = dma.hbm_to_vmem [thread:$0]  %s339_s1, 2048, %s29_s20, [#allocation6], %s293_s15, %s293_s15, %s294_s16  }
  0x19   :  { %286 = dma.done.wait [#allocation3], 256  }
  0x1a   :  { %287 = vsyncadd [#allocation3], 4294967040 }
  0x1b   :  { %288 = dma.done.wait [#allocation6], 2048  }
  0x1c   :  { %289 = vsyncadd [#allocation6], 4294965248  ;;  %v60_v0 = vld [vmem:[#allocation5 + $0x78] sm:$0xff]  ;;  %v59_v1 = vld [vmem:[#allocation5 + $0x70] sm:$0xff]  ;;  %s296_s24 = smov [#allocation7]  }
  0x1d   :  { %186 = vmatprep.subr.mxu0 %v60_v0  ;;  %v58_v2 = vld [vmem:[#allocation5 + $0x68] sm:$0xff]  ;;  %v43_v3 = vld [vmem:[#allocation2] sm:$0xff]  ;;  %v57_v4 = vld [vmem:[#allocation5 + $0x60] sm:$0xff]  ;;  %s154_s25 = sshll.u32 %s296_s24, 4  ;;  %s155_s25 = int_to_ptr.vmem [resolvable:$true] %s154_s25 }
  0x1e   :  { %187 = vmatpush3.xpose.msra.mxu0 %v60_v0  ;;  %218 = vmatprep.mubr.f32.mxu0 %v43_v3  ;;  %v56_v5 = vld [vmem:[#allocation5 + $0x58] sm:$0xff]  ;;  %v55_v6 = vld [vmem:[#allocation5 + $0x50] sm:$0xff]  ;;  %v54_v7 = vld [vmem:[#allocation5 + $0x48] sm:$0xff]  ;;  %s266_s26 = scalar_lea.vmem %s155_s25, 256  ;;  %p271_p11 = scmp.lt.s32.totalorder %s155_s25, %s155_s25 }
  0x1f   :  { %188 = vmatprep.subr.mxu0 %v59_v1  ;;  %v53_v8 = vld [vmem:[#allocation5 + $0x40] sm:$0xff]  ;;  %v52_v9 = vld [vmem:[#allocation5 + $0x38] sm:$0xff]  ;;  %v51_v10 = vld [vmem:[#allocation5 + $0x30] sm:$0xff]  ;;  %p267_p10 = scmp.ne.s32.totalorder %s155_s25, %s266_s26  ;;  %p272_p12 = scmp.lt.s32.totalorder %s266_s26, %s266_s26 }
  0x20   :  { %v50_v11 = vld [vmem:[#allocation5 + $0x28] sm:$0xff]  ;;  %v49_v12 = vld [vmem:[#allocation5 + $0x20] sm:$0xff]  ;;  %v48_v13 = vld [vmem:[#allocation5 + $0x18] sm:$0xff] }
  0x21   :  { %v47_v14 = vld [vmem:[#allocation5 + $0x10] sm:$0xff]  ;;  %v46_v15 = vld [vmem:[#allocation5 + $0x8] sm:$0xff]  ;;  %v45_v16 = vld [vmem:[#allocation5] sm:$0xff]  ;;  %p273_p13 = por %p272_p12, %p271_p11 }
  0x22   :  { %189 = vmatpush3.xpose.msra.mxu0 %v59_v1  ;;  %v44_v17 = vld [vmem:[#allocation2 + $0x8] sm:$0xff]  ;;  %v167_v18 = vld [vmem:[%s340_s2] ss:$0 sm:$0xff] }
  0x23   :  { %190 = vmatprep.subr.mxu0 %v58_v2  ;;  %p274_p0 = pnand %p273_p13, %p267_p10 }
  0x26   :  { %191 = vmatpush3.xpose.msra.mxu0 %v58_v2 }
  0x27   :  { %192 = vmatprep.subr.mxu0 %v57_v4 }
  0x2a   :  { %193 = vmatpush3.xpose.msra.mxu0 %v57_v4 }
  0x2b   :  { %194 = vmatprep.subr.mxu0 %v56_v5 }
  0x2e   :  { %195 = vmatpush3.xpose.msra.mxu0 %v56_v5 }
  0x2f   :  { %196 = vmatprep.subr.mxu0 %v55_v6 }
  0x32   :  { %197 = vmatpush3.xpose.msra.mxu0 %v55_v6 }
  0x33   :  { %198 = vmatprep.subr.mxu0 %v54_v7 }
  0x36   :  { %199 = vmatpush3.xpose.msra.mxu0 %v54_v7 }
  0x37   :  { %200 = vmatprep.subr.mxu0 %v53_v8 }
  0x3a   :  { %201 = vmatpush3.xpose.msra.mxu0 %v53_v8 }
  0x3b   :  { %202 = vmatprep.subr.mxu0 %v52_v9 }
  0x3e   :  { %203 = vmatpush3.xpose.msra.mxu0 %v52_v9 }
  0x3f   :  { %204 = vmatprep.subr.mxu0 %v51_v10 }
  0x42   :  { %205 = vmatpush3.xpose.msra.mxu0 %v51_v10 }
  0x43   :  { %206 = vmatprep.subr.mxu0 %v50_v11 }
  0x46   :  { %207 = vmatpush3.xpose.msra.mxu0 %v50_v11 }
  0x47   :  { %208 = vmatprep.subr.mxu0 %v49_v12 }
  0x4a   :  { %209 = vmatpush3.xpose.msra.mxu0 %v49_v12 }
  0x4b   :  { %210 = vmatprep.subr.mxu0 %v48_v13 }
  0x4e   :  { %211 = vmatpush3.xpose.msra.mxu0 %v48_v13 }
  0x4f   :  { %212 = vmatprep.subr.mxu0 %v47_v14 }
  0x52   :  { %213 = vmatpush3.xpose.msra.mxu0 %v47_v14 }
  0x53   :  { %214 = vmatprep.subr.mxu0 %v46_v15 }
  0x56   :  { %215 = vmatpush3.xpose.msra.mxu0 %v46_v15 }
  0x57   :  { %216 = vmatprep.subr.mxu0 %v45_v16 }
  0x5a   :  { %217 = vmatpush3.xpose.msra.mxu0 %v45_v16 }
  0x5d   :  { %219 = vmatmul.mubr.f32.vlgmr.msra.gmra.mxu0 %v44_v17 }
 0x11d   :  { %v220_v19 = vpop.f32.mrf.mxu0 }
 0x11e   :  { %v140_v20 = vadd.f32 %v220_v19, %v167_v18 }
 0x11f   :  { %v134_v21 = vpop.f32.mrf.mxu0 }
 0x120   :  { %v144_v22 = vmax.f32 %v140_v20, 0.0  ;;  %v135_v23 = vadd.f32 %v167_v18, %v134_v21 }
 0x122   :  { %v146_v24 = vmin.f32 %v144_v22, 6.0  ;;  %v143_v25 = vmax.f32 %v135_v23, 0.0 }
 0x124   :  { %148 = vst [vmem:[#allocation7 + $0x8] sm:$0xff] %v146_v24  ;;  %v145_v26 = vmin.f32 %v143_v25, 6.0 }
 0x126   :  { %147 = vst [vmem:[#allocation7] sm:$0xff] %v145_v26 }
 0x127   :  { %277 = shalt.err (!%p274_p0)
}
 0x128   :  { %160 = dma.vmem_to_hbm [thread:$0]  %s155_s25, 256, %s341_s3, [#allocation4], %s293_s15, %s293_s15, %s294_s16  }
 0x129   :  { %290 = dma.done.wait [#allocation4], 256  }
 0x12a   :  { %291 = vsyncadd [#allocation4], 4294967040 }
 0x12b   :  { %164 = vsyncpa [#allocation3], 1 }
 0x12c   :  { %165 = vsyncpa [#allocation6], 1 }
 0x12d   :  { %166 = vsyncpa [#allocation4], 1 }

</bundles_post_ra>
